<compile_context>
chip_gen: v6e
topology: v6e:2x2x1
jax: 0.10.0
libtpu: 0.0.40
codegen_flags: <defaults>
</compile_context>

<pallas_src>
import functools
import math

import jax
import jax.numpy as jnp
from jax.experimental import pallas as pl
from jax.experimental.pallas import tpu as pltpu


def _cdiv(a, b):
    return -(-a // b)


def _round_up(a, b):
    return _cdiv(a, b) * b


def _tpu_defaults():
    """(num_core_splits, vmem_limit_bytes) keyed off the local TPU generation."""
    kind = ""
    try:
        kind = jax.devices()[0].device_kind.lower()
    except Exception:  # pragma: no cover - non-TPU / odd backends
        pass
    is_v7 = "v7" in kind
    # v7x has 2 TensorCores per chip but only 64 MiB VMEM per TC; earlier
    # generations are single-TC with 128 MiB VMEM.
    num_core_splits = 2 if is_v7 else 1
    vmem_limit_bytes = (48 << 20) if is_v7 else (64 << 20)
    return num_core_splits, vmem_limit_bytes


def _bce_weighted_kernel(logits_ref, labels_ref, out_ref, acc_ref, *,
                         weight, rows_valid):
    c = pl.program_id(0)
    i = pl.program_id(1)
    steps = pl.num_programs(1)

    @pl.when(i == 0)
    def _():
        acc_ref[...] = jnp.zeros_like(acc_ref)

    tile_rows, lane_w = logits_ref.shape

    # Inputs stream in their native dtype; upcast to f32 in VMEM.
    x = logits_ref[...].astype(jnp.float32)
    y = labels_ref[...].astype(jnp.float32)

    # Numerically stable BCE-with-logits, reduction='none':
    #   loss = max(x, 0) - x*y + log1p(exp(-|x|))
    loss = jnp.maximum(x, 0.0) - x * y + jnp.log1p(jnp.exp(-jnp.abs(x)))

    # loss[labels.bool()] *= labels[labels.bool()] * weight
    # select-free multiplier: y*weight where y != 0, else 1
    loss = loss * (y * weight + (y == 0.0).astype(jnp.float32))

    # Rows past `rows_valid` belong to blocks overhanging the array end; their
    # contents are unspecified (garbage), so select them to exactly zero before
    # accumulating.  A (tile_rows, 1) row mask keeps the extra VPU work tiny
    # and lets the lane broadcast happen for free.
    row_start = (c * steps + i) * tile_rows
    row_ids = jax.lax.broadcasted_iota(jnp.int32, (tile_rows, 1), 0) + row_start
    loss = jnp.where(row_ids < rows_valid, loss, 0.0)

    # Vreg-shaped partial-sum accumulator: fold rows into groups of 8 sublanes
    # and add on the VPU; the single cross-lane reduce happens in the wrapper.
    # Note: f32 accumulation per core; fine for typical sizes.
    acc_ref[...] += loss.reshape(-1, 8, lane_w).sum(axis=0)

    @pl.when(i == steps - 1)
    def _():
        out_ref[0] = acc_ref[...]


def bce_with_logits_loss_weighted(
    logits,
    labels,
    weight,
    *,
    # ~4 MiB of f32 logits per block (+ labels) keeps per-step overhead <~7%
    # on v6e/v7x while leaving headroom for pipeline buffers + in-kernel
    # temporaries under the explicit vmem_limit_bytes below.
    target_block_bytes=4 << 20,
    # Below this size the pallas_call launch/pipeline overhead dominates; the
    # fused XLA elementwise+reduce path is faster.
    min_pallas_elements=64 * 1024,
    # Opt-in only: casting f32 labels to bf16 in the wrapper is a net HBM
    # regression (extra convert pass) and loses precision for soft targets.
    cast_labels_bf16=False,
    num_core_splits=None,
    vmem_limit_bytes=None,
):
    assert logits.shape == labels.shape
    total = math.prod(logits.shape)

    if total < min_pallas_elements:
        # Tiny problem: pure-jnp path (same math as the kernel).
        x = logits.astype(jnp.float32)
        y = labels.astype(jnp.float32)
        loss = jnp.maximum(x, 0.0) - x * y + jnp.log1p(jnp.exp(-jnp.abs(x)))
        loss = loss * (y * weight + (y == 0.0).astype(jnp.float32))
        return jnp.mean(loss)

    auto_splits, auto_vmem = _tpu_defaults()
    if num_core_splits is None:
        num_core_splits = auto_splits
    if vmem_limit_bytes is None:
        vmem_limit_bytes = auto_vmem

    # Flatten in native dtypes: a reshape of a contiguous array is free.
    x = logits.reshape(-1)
    y = labels.reshape(-1)
    if cast_labels_bf16:
        y = y.astype(jnp.bfloat16)

    # Lane-dense slab: 1024 lanes when that divides the element count (no pad),
    # else 128 (far more likely to divide; tiny tail pad otherwise).
    lane_w = 1024 if (total % 1024 == 0 and total >= 64 * 1024) else 128

    # Only pad when the 2-D reshape demands it (total not a multiple of
    # lane_w, or fewer than 8 rows).  Pad values (-1e4, 0) contribute exactly
    # zero loss: max(x,0)=0, -x*0=0, log1p(exp(-1e4))==0 in f32.
    # TODO(synk): for huge ragged tensors this pad is still a full-array copy;
    # a raw-HBM manual-DMA path could avoid it.
    padded_total = max(_round_up(total, lane_w), 8 * lane_w)
    if padded_total != total:
        pad = padded_total - total
        x = jnp.pad(x, (0, pad), constant_values=-1e4)
        y = jnp.pad(y, (0, pad), constant_values=0)

    rows = padded_total // lane_w
    x2 = x.reshape(rows, lane_w)
    y2 = y.reshape(rows, lane_w)

    # Block sizing (budgeted as if logits were f32; bf16 inputs just get
    # cheaper).  tile_rows is a multiple of 8 and never exceeds the array.
    max_tile_rows = max(8, ((target_block_bytes // (lane_w * 4)) // 8) * 8)
    tile_rows = min(max_tile_rows, (rows // 8) * 8)
    nblocks = _cdiv(rows, tile_rows)
    steps = _cdiv(nblocks, num_core_splits)

    kernel = functools.partial(
        _bce_weighted_kernel, weight=float(weight), rows_valid=rows)

    def in_map(c, i):
        # Clamp so grid points past the last block simply re-read it; the
        # in-kernel row mask zeroes their contribution.
        return (jnp.minimum(c * steps + i, nblocks - 1), 0)

    partials = pl.pallas_call(
        kernel,
        out_shape=jax.ShapeDtypeStruct((num_core_splits, 8, lane_w), jnp.float32),
        grid_spec=pltpu.PrefetchScalarGridSpec(
            num_scalar_prefetch=0,
            grid=(num_core_splits, steps),
            in_specs=[
                pl.BlockSpec((tile_rows, lane_w), in_map),
                pl.BlockSpec((tile_rows, lane_w), in_map),
            ],
            out_specs=pl.BlockSpec((1, 8, lane_w), lambda c, i: (c, 0, 0)),
            scratch_shapes=[pltpu.VMEM((8, lane_w), jnp.float32)],
        ),
        compiler_params=pltpu.CompilerParams(
            dimension_semantics=("parallel", "arbitrary"),
            vmem_limit_bytes=vmem_limit_bytes,
        ),
    )(x2, y2)

    # Single cross-lane reduce of the (num_cores, 8, lane_w) partials + mean
    # over the TRUE element count.
    return jnp.sum(partials) / total


def _reference(logits, labels, weight):
    x = logits.astype(jnp.float32)
    y = labels.astype(jnp.float32)
    loss = jnp.maximum(x, 0.0) - x * y + jnp.log1p(jnp.exp(-jnp.abs(x)))
    loss = jnp.where(y != 0.0, loss * y * weight, loss)
    return jnp.mean(loss)


if __name__ == "__main__":
    # Deterministic "parameter": the positive-class weight from __init__.
    WEIGHT = 3.0

    key = jax.random.PRNGKey(0)
    k1, k2 = jax.random.split(key)

    # NCHW logits/labels, small shape (kernel path forced; 128-lane slab,
    # single block, no padding).
    shape = (2, 4, 16, 16)
    logits = jax.random.normal(k1, shape, dtype=jnp.float32)
    labels = (jax.random.uniform(k2, shape) > 0.5).astype(jnp.float32)
    out = jax.block_until_ready(
        bce_with_logits_loss_weighted(logits, labels, WEIGHT,
                                      min_pallas_elements=0))
    ref = _reference(logits, labels, WEIGHT)
    assert jnp.allclose(out, ref, rtol=1e-5, atol=1e-5), (out, ref)

    # Ragged shape (not a multiple of 128): minimal tail pad + in-kernel row
    # mask for the overhanging block.
    shape2 = (2, 3, 17, 11)
    logits2 = jax.random.normal(k1, shape2, dtype=jnp.float32)
    labels2 = (jax.random.uniform(k2, shape2) > 0.5).astype(jnp.float32)
    out2 = jax.block_until_ready(
        bce_with_logits_loss_weighted(logits2, labels2, WEIGHT,
                                      min_pallas_elements=0))
    ref2 = _reference(logits2, labels2, WEIGHT)
    assert jnp.allclose(out2, ref2, rtol=1e-5, atol=1e-5), (out2, ref2)

    # Default path: bf16 logits streamed in their native dtype (kernel
    # upcasts), 1024-lane slab, no wrapper casts or pads.
    shape3 = (2, 8, 64, 128)
    logits3 = jax.random.normal(k1, shape3, dtype=jnp.bfloat16)
    labels3 = (jax.random.uniform(k2, shape3) > 0.5).astype(jnp.float32)
    out3 = jax.block_until_ready(
        bce_with_logits_loss_weighted(logits3, labels3, WEIGHT))
    ref3 = _reference(logits3, labels3, WEIGHT)
    assert jnp.allclose(out3, ref3, rtol=1e-4, atol=1e-5), (out3, ref3)

    print("KERNEL_OK")
</pallas_src>

<mosaic_0001>
module attributes {stable_mosaic.version = 11 : i64} {
  func.func @_bce_weighted_kernel(%arg0: i32, %arg1: i32, %arg2: memref<16x128xf32, #tpu.memory_space<vmem>>, %arg3: memref<16x128xf32, #tpu.memory_space<vmem>>, %arg4: memref<1x8x128xf32, #tpu.memory_space<vmem>>, %arg5: memref<8x128xf32, #tpu.memory_space<vmem>>) attributes {dimension_semantics = [#tpu.dimension_semantics<parallel>, #tpu.dimension_semantics<arbitrary>], iteration_bounds = array<i64: 1, 1>, scalar_prefetch = 0 : i64, scratch_operands = 1 : i64, tpu.core_type = #tpu.core_type<tc>, window_params = [{transform_indices = @transform_0, window_bounds = array<i64: 16, 128>}, {transform_indices = @transform_1, window_bounds = array<i64: 16, 128>}, {transform_indices = @transform_2, window_bounds = array<i64: 1, 8, 128>}]} {
    %c0_i32 = arith.constant 0 : i32
    %0 = arith.cmpi eq, %arg1, %c0_i32 : i32
    %1 = arith.extui %0 : i1 to i32
    %c0_i32_0 = arith.constant 0 : i32
    %2 = arith.cmpi ne, %1, %c0_i32_0 : i32
    scf.if %2 {
      %cst_16 = arith.constant 0.000000e+00 : f32
      %43 = vector.broadcast %cst_16 : f32 to vector<8x128xf32>
      %c0_17 = arith.constant 0 : index
      %c0_18 = arith.constant 0 : index
      %44 = vector.load %arg5[%c0_17, %c0_18] : memref<8x128xf32, #tpu.memory_space<vmem>>, vector<8x128xf32>
      tpu.vector_store %arg5[%c0_17, %c0_18], %43 {strides = array<i32>} : memref<8x128xf32, #tpu.memory_space<vmem>>, vector<8x128xf32>,
    } else {
    }
    %c0 = arith.constant 0 : index
    %c0_1 = arith.constant 0 : index
    %3 = vector.load %arg2[%c0, %c0_1] : memref<16x128xf32, #tpu.memory_space<vmem>>, vector<16x128xf32>
    %c0_2 = arith.constant 0 : index
    %c0_3 = arith.constant 0 : index
    %4 = vector.load %arg3[%c0_2, %c0_3] : memref<16x128xf32, #tpu.memory_space<vmem>>, vector<16x128xf32>
    %cst = arith.constant 0.000000e+00 : f32
    %5 = vector.broadcast %cst : f32 to vector<16x128xf32>
    %6 = arith.maximumf %3, %5 : vector<16x128xf32>
    %7 = arith.mulf %3, %4 : vector<16x128xf32>
    %8 = arith.subf %6, %7 : vector<16x128xf32>
    %9 = math.absf %3 : vector<16x128xf32>
    %cst_4 = arith.constant 0.000000e+00 : f32
    %10 = vector.broadcast %cst_4 : f32 to vector<16x128xf32>
    %11 = arith.subf %10, %9 : vector<16x128xf32>
    %12 = math.exp %11 : vector<16x128xf32>
    %13 = math.log1p %12 : vector<16x128xf32>
    %14 = arith.addf %8, %13 : vector<16x128xf32>
    %cst_5 = arith.constant 3.000000e+00 : f32
    %15 = vector.broadcast %cst_5 : f32 to vector<16x128xf32>
    %16 = arith.mulf %4, %15 : vector<16x128xf32>
    %cst_6 = arith.constant 0.000000e+00 : f32
    %17 = vector.broadcast %cst_6 : f32 to vector<16x128xf32>
    %18 = arith.cmpf oeq, %4, %17 : vector<16x128xf32>
    %19 = arith.extui %18 : vector<16x128xi1> to vector<16x128xi32>
    %20 = arith.sitofp %19 : vector<16x128xi32> to vector<16x128xf32>
    %21 = arith.addf %16, %20 : vector<16x128xf32>
    %22 = arith.mulf %14, %21 : vector<16x128xf32>
    %c1_i32 = arith.constant 1 : i32
    %23 = arith.muli %arg0, %c1_i32 : i32
    %24 = arith.addi %23, %arg1 : i32
    %c16_i32 = arith.constant 16 : i32
    %25 = arith.muli %24, %c16_i32 : i32
    %26 = tpu.iota {dimensions = array<i32: 0>} : vector<16x1xi32>
    %27 = vector.broadcast %25 : i32 to vector<16x1xi32>
    %28 = arith.addi %26, %27 : vector<16x1xi32>
    %c16_i32_7 = arith.constant 16 : i32
    %29 = vector.broadcast %c16_i32_7 : i32 to vector<16x1xi32>
    %30 = arith.cmpi slt, %28, %29 : vector<16x1xi32>
    %cst_8 = arith.constant 0.000000e+00 : f32
    %31 = vector.shape_cast %30 : vector<16x1xi1> to vector<16x1xi1>
    %32 = vector.broadcast %31 : vector<16x1xi1> to vector<16x128xi1>
    %33 = vector.broadcast %cst_8 : f32 to vector<16x128xf32>
    %34 = arith.select %32, %22, %33 : vector<16x128xi1>, vector<16x128xf32>
    %c0_9 = arith.constant 0 : index
    %c0_10 = arith.constant 0 : index
    %35 = vector.load %arg5[%c0_9, %c0_10] : memref<8x128xf32, #tpu.memory_space<vmem>>, vector<8x128xf32>
    %36 = vector.shape_cast %34 : vector<16x128xf32> to vector<2x8x128xf32>
    %cst_11 = arith.constant dense<0.000000e+00> : vector<8x128xf32>
    %37 = vector.multi_reduction <add>, %36, %cst_11 [0] : vector<2x8x128xf32> to vector<8x128xf32>
    %38 = arith.addf %35, %37 : vector<8x128xf32>
    %c0_12 = arith.constant 0 : index
    %c0_13 = arith.constant 0 : index
    %39 = vector.load %arg5[%c0_12, %c0_13] : memref<8x128xf32, #tpu.memory_space<vmem>>, vector<8x128xf32>
    tpu.vector_store %arg5[%c0_12, %c0_13], %38 {strides = array<i32>} : memref<8x128xf32, #tpu.memory_space<vmem>>, vector<8x128xf32>,
    %c0_i32_14 = arith.constant 0 : i32
    %40 = arith.cmpi eq, %arg1, %c0_i32_14 : i32
    %41 = arith.extui %40 : i1 to i32
    %c0_i32_15 = arith.constant 0 : i32
    %42 = arith.cmpi ne, %41, %c0_i32_15 : i32
    scf.if %42 {
      %c0_16 = arith.constant 0 : index
      %c0_17 = arith.constant 0 : index
      %43 = vector.load %arg5[%c0_16, %c0_17] : memref<8x128xf32, #tpu.memory_space<vmem>>, vector<8x128xf32>
      %c0_18 = arith.constant 0 : index
      %c0_19 = arith.constant 0 : index
      %c0_20 = arith.constant 0 : index
      %44 = vector.load %arg4[%c0_18, %c0_19, %c0_20] : memref<1x8x128xf32, #tpu.memory_space<vmem>>, vector<1x8x128xf32>
      %45 = vector.shape_cast %44 : vector<1x8x128xf32> to vector<8x128xf32>
      %46 = vector.shape_cast %43 : vector<8x128xf32> to vector<1x8x128xf32>
      tpu.vector_store %arg4[%c0_18, %c0_19, %c0_20], %46 {strides = array<i32>} : memref<1x8x128xf32, #tpu.memory_space<vmem>>, vector<1x8x128xf32>,
    } else {
    }
    return
  }
  func.func @transform_0(%arg0: i32, %arg1: i32) -> (i32, i32) {
    %c1_i32 = arith.constant 1 : i32
    %0 = arith.muli %arg0, %c1_i32 : i32
    %1 = arith.addi %0, %arg1 : i32
    %c0_i32 = arith.constant 0 : i32
    %2 = arith.minsi %1, %c0_i32 : i32
    %c0_i32_0 = arith.constant 0 : i32
    %c0_i32_1 = arith.constant 0 : i32
    return %2, %c0_i32_0 : i32, i32
  }
  func.func @transform_1(%arg0: i32, %arg1: i32) -> (i32, i32) {
    %c1_i32 = arith.constant 1 : i32
    %0 = arith.muli %arg0, %c1_i32 : i32
    %1 = arith.addi %0, %arg1 : i32
    %c0_i32 = arith.constant 0 : i32
    %2 = arith.minsi %1, %c0_i32 : i32
    %c0_i32_0 = arith.constant 0 : i32
    %c0_i32_1 = arith.constant 0 : i32
    return %2, %c0_i32_0 : i32, i32
  }
  func.func @transform_2(%arg0: i32, %arg1: i32) -> (i32, i32, i32) {
    %c0_i32 = arith.constant 0 : i32
    %c0_i32_0 = arith.constant 0 : i32
    %c0_i32_1 = arith.constant 0 : i32
    return %arg0, %c0_i32, %c0_i32_0 : i32, i32, i32
  }
}

</mosaic_0001>

<bundles_post_ra>
// kernel: tpu_custom_call.1
= control target key start
LH: loop header
LB: loop body
LE: loop exit
PB: predicated region body
PF: predicated region fallthrough
CT: control target
= control target key end

     0   :  { %7 = vsyncpa [#allocation4], 0  ;;  %s272_s0 = inlined_call_operand.hbm [shape: f32[16,128], index: 0, kind: input, shape index: {}]   ;;  %s273_s1 = inlined_call_operand.hbm [shape: f32[16,128], index: 1, kind: input, shape index: {}]   ;;  %s274_s2 = inlined_call_operand.hbm [shape: f32[1,8,128], index: 2, kind: output, shape index: {}]  }
   0x1   :  { %8 = vsyncpa [#allocation7], 0 }
   0x2   :  { %9 = vsyncpa [#allocation5], 0  ;;  %s242_s9 = smov [#allocation3]  }
   0x3   :  { %s21_s10 = sshll.u32 %s242_s9, 4  ;;  %s22_s10 = int_to_ptr.vmem [resolvable:$true] %s21_s10 }
   0x4   :  { %s184_s11 = scalar_lea.vmem %s22_s10, 256  ;;  %p189_p1 = scmp.lt.s32.totalorder %s22_s10, %s22_s10 }
   0x5   :  { %p185_p0 = scmp.ne.s32.totalorder %s22_s10, %s184_s11  ;;  %p190_p2 = scmp.lt.s32.totalorder %s184_s11, %s184_s11 }
   0x7   :  { %p191_p3 = por %p190_p2, %p189_p1 }
   0x9   :  { %p192_p4 = pnand %p191_p3, %p185_p0 }
   0xb   :  { %195 = shalt.err (!%p192_p4)
}
   0xc   :  { %s243_s12 = smov 128   ;;  %s244_s13 = smov 8  }
   0xd   :  { %27 = dma.hbm_to_vmem [thread:$0]  %s272_s0, 256, %s22_s10, [#allocation4], %s243_s12, %s243_s12, %s244_s13  }
   0xe   :  { %s245_s16 = smov [#allocation6]  }
   0xf   :  { %s39_s17 = sshll.u32 %s245_s16, 4  ;;  %s40_s17 = int_to_ptr.vmem [resolvable:$true] %s39_s17 }
  0x10   :  { %s204_s18 = scalar_lea.vmem %s40_s17, 256  ;;  %p209_p6 = scmp.lt.s32.totalorder %s40_s17, %s40_s17 }
  0x11   :  { %p205_p5 = scmp.ne.s32.totalorder %s40_s17, %s204_s18  ;;  %p210_p7 = scmp.lt.s32.totalorder %s204_s18, %s204_s18 }
  0x13   :  { %p211_p8 = por %p210_p7, %p209_p6 }
  0x15   :  { %p212_p9 = pnand %p211_p8, %p205_p5 }
  0x17   :  { %215 = shalt.err (!%p212_p9)
}
  0x18   :  { %45 = dma.hbm_to_vmem [thread:$0]  %s273_s1, 256, %s40_s17, [#allocation7], %s243_s12, %s243_s12, %s244_s13  }
  0x19   :  { %236 = dma.done.wait [#allocation4], 256  }
  0x1a   :  { %237 = vsyncadd [#allocation4], 4294967040 }
  0x1b   :  { %238 = dma.done.wait [#allocation7], 256  }
  0x1c   :  { %239 = vsyncadd [#allocation7], 4294967040  ;;  %v65_v0 = vld [vmem:[#allocation3] sm:$0xff]  ;;  %v66_v1 = vld [vmem:[#allocation3 + $0x8] sm:$0xff]  ;;  %v246_v27 = vmov 0.0   ;;  %s247_s0 = smov [#allocation8]  }
  0x1d   :  { %v75_v2 = vand.u32 2147483647, %v65_v0  ;;  %v76_v3 = vand.u32 2147483647, %v66_v1  ;;  %v67_v14 = vld [vmem:[#allocation6] sm:$0xff]  ;;  %v68_v15 = vld [vmem:[#allocation6 + $0x8] sm:$0xff] }
  0x1e   :  { %v69_v16 = vmax.f32 %v65_v0, 0.0  ;;  %v71_v18 = vmul.f32 %v67_v14, %v65_v0  ;;  %vm105_vm0 = vcmp.eq.f32.partialorder %v67_v14, 0.0  ;;  %v70_v21 = vmax.f32 %v66_v1, 0.0  ;;  %s146_s1 = sshll.u32 %s247_s0, 4  ;;  %s147_s1 = int_to_ptr.vmem [resolvable:$true] %s146_s1 }
  0x1f   :  { %v77_v4 = vsub.f32 0.0, %v75_v2  ;;  %v78_v5 = vsub.f32 0.0, %v76_v3  ;;  %v72_v22 = vmul.f32 %v68_v15, %v66_v1  ;;  %vm106_vm1 = vcmp.eq.f32.partialorder %v68_v15, 0.0  ;;  %s216_s21 = scalar_lea.vmem %s147_s1, 128  ;;  %p221_p11 = scmp.lt.s32.totalorder %s147_s1, %s147_s1 }
  0x20   :  { %v103_v24 = vmul.f32 3.0, %v67_v14  ;;  %v104_v26 = vmul.f32 3.0, %v68_v15  ;;  %v160_v28 = vsel %vm105_vm0, 1.0, %v246_v27  ;;  %v73_v30 = vsub.f32 %v69_v16, %v71_v18  ;;  %p217_p10 = scmp.ne.s32.totalorder %s147_s1, %s216_s21  ;;  %p222_p12 = scmp.lt.s32.totalorder %s216_s21, %s216_s21 }
  0x21   :  { %v79_v6 = vmul.f32 1.442695, %v77_v4  ;;  %v81_v7 = vmul.f32 1.442695, %v78_v5  ;;  %v161_v32 = vsel %vm106_vm1, 1.0, %v246_v27  ;;  %v74_v34 = vsub.f32 %v70_v21, %v72_v22 }
  0x22   :  { %v111_v37 = vadd.f32 %v160_v28, %v103_v24  ;;  %v112_v39 = vadd.f32 %v161_v32, %v104_v26  ;;  %p223_p13 = por %p222_p12, %p221_p11 }
  0x23   :  { %168 = vpow2.f32 %v79_v6 }
  0x24   :  { %170 = vpow2.f32 %v81_v7  ;;  %p224_p0 = pnand %p223_p13, %p217_p10 }
  0x30   :  { %v169_v8 = vpop.eup %168 }
  0x31   :  { %v171_v9 = vpop.eup %170  ;;  %v83_v10 = vadd.f32 1.0, %v169_v8  ;;  %v86_v12 = vmul.f32 -0.5, %v169_v8  ;;  %v89_v19 = vand.u32 2147483647, %v169_v8 }
  0x32   :  { %v92_v11 = vadd.f32 1.0, %v171_v9  ;;  %v95_v13 = vmul.f32 -0.5, %v171_v9  ;;  %v98_v23 = vand.u32 2147483647, %v171_v9 }
  0x33   :  { %172 = vlog2.f32 %v83_v10  ;;  %v87_v17 = vadd.f32 1.0, %v86_v12  ;;  %vm90_vm2 = vcmp.lt.f32.partialorder %v89_v19, 0.0004427343 }
  0x34   :  { %174 = vlog2.f32 %v92_v11  ;;  %v96_v20 = vadd.f32 1.0, %v95_v13  ;;  %vm99_vm3 = vcmp.lt.f32.partialorder %v98_v23, 0.0004427343 }
  0x35   :  { %v88_v25 = vmul.f32 %v169_v8, %v87_v17 }
  0x36   :  { %v97_v31 = vmul.f32 %v171_v9, %v96_v20 }
  0x40   :  { %v173_v29 = vpop.eup %172 }
  0x41   :  { %v175_v33 = vpop.eup %174  ;;  %v85_v35 = vmul.f32 0.6931472, %v173_v29 }
  0x42   :  { %v94_v36 = vmul.f32 0.6931472, %v175_v33 }
  0x43   :  { %v91_v38 = vsel %vm90_vm2, %v88_v25, %v85_v35 }
  0x44   :  { %v100_v40 = vsel %vm99_vm3, %v97_v31, %v94_v36  ;;  %v101_v41 = vadd.f32 %v91_v38, %v73_v30 }
  0x45   :  { %v102_v42 = vadd.f32 %v100_v40, %v74_v34 }
  0x46   :  { %v113_v43 = vmul.f32 %v111_v37, %v101_v41 }
  0x47   :  { %v114_v44 = vmul.f32 %v112_v39, %v102_v42 }
  0x49   :  { %v132_v45 = vadd.f32 %v114_v44, %v113_v43 }
  0x4b   :  { %139 = vst [vmem:[#allocation8] sm:$0xff] %v132_v45 }
  0x4c   :  { %227 = shalt.err (!%p224_p0)
}
  0x4d   :  { %149 = dma.vmem_to_hbm [thread:$0]  %s147_s1, 128, %s274_s2, [#allocation5]  }
  0x4e   :  { %240 = dma.done.wait [#allocation5], 128  }
  0x4f   :  { %241 = vsyncadd [#allocation5], 4294967168 }
  0x50   :  { %153 = vsyncpa [#allocation4], 1 }
  0x51   :  { %154 = vsyncpa [#allocation7], 1 }
  0x52   :  { %155 = vsyncpa [#allocation5], 1 }

</bundles_post_ra>
